<compile_context>
chip_gen: v7x
topology: tpu7x:2x2x1
jax: 0.10.0
libtpu: 0.0.40
codegen_flags: <defaults>
</compile_context>

<pallas_src>
import functools

import jax
import jax.numpy as jnp
from jax.experimental import pallas as pl
from jax.experimental.pallas import tpu as pltpu

NEURONS = 8
IN_FEATURES = 15
HIDDEN2 = 2 * NEURONS          # 16
OUT_CLASSES = 4
BN_EPS = 1e-5

# ---- packed-parameter slab layout (64 rows x 16 lanes, f32) ----------------
ROW_W1 = 0      # W1 : (8, 15)   (PyTorch (out, in) layout, no transpose)
ROW_W2 = 8      # W2 : (16, 8)
ROW_W3 = 24     # W3 : (8, 16)
ROW_W4 = 32     # W4 : (4, 8)
ROW_BN8 = 40    # col0 g1, col1 be1, col2 g3, col3 be3, col4[0:4] b4
ROW_BN16 = 48   # col0 g2, col1 be2
PACK_ROWS = 64
PACK_COLS = 16

_UNROLL_STORE_TILES = 16   # static unrolled tile stores up to this many tiles


def _round_up(v, m):
    return (v + m - 1) // m * m


def _net_kernel(x_ref, p_ref, o_ref, h1_ref, s1_ref, ss1_ref, *, batch, tile_b):
    """One grid step = one batch tile of layer 1 + BN1 stat accumulation.

    The last grid step additionally runs BN1..head on the fully resident,
    feature-major (8, B_pad) activations and writes the (4, B_pad) output.
    Linear biases b1..b3 are omitted: training-mode BatchNorm's batch-mean
    subtraction cancels any per-feature additive constant exactly.
    """
    t = pl.program_id(0)
    b_pad = h1_ref.shape[1]
    num_tiles = b_pad // tile_b
    inv_b = 1.0 / batch                        # real (unpadded) batch size

    @pl.when(t == 0)
    def _init():
        s1_ref[...] = jnp.zeros_like(s1_ref)
        ss1_ref[...] = jnp.zeros_like(ss1_ref)

    # ---- streamed layer 1: h1_tile = W1 @ x_tile^T -> (8, TB), lane-dense.
    w1 = p_ref[ROW_W1:ROW_W1 + NEURONS, 0:IN_FEATURES]            # (8, 15)
    x_t = x_ref[...]                                               # (TB, 15)
    h1_t = jax.lax.dot_general(w1, x_t, (((1,), (1,)), ((), ())),
                               preferred_element_type=jnp.float32)  # (8, TB)
    # Padded batch rows are zero and (bias-free) contribute nothing here.
    s1_ref[...] += jnp.sum(h1_t, axis=1, keepdims=True)
    ss1_ref[...] += jnp.sum(h1_t * h1_t, axis=1, keepdims=True)

    if num_tiles == 1:
        h1_ref[...] = h1_t
    elif num_tiles <= _UNROLL_STORE_TILES:
        for i in range(num_tiles):
            @pl.when(t == i)
            def _store(i=i):
                h1_ref[:, i * tile_b:(i + 1) * tile_b] = h1_t
    else:
        # TODO(synk): scalable path (dynamic 128-aligned lane-offset store);
        # only used when the batch spans > _UNROLL_STORE_TILES tiles.
        off = pl.multiple_of(t * tile_b, tile_b)
        h1_ref[:, pl.ds(off, tile_b)] = h1_t

    # ---- final step: BN1..head on the VMEM-resident activations -----------
    @pl.when(t == num_tiles - 1)
    def _finalize():
        g1 = p_ref[ROW_BN8:ROW_BN8 + NEURONS, 0:1]
        be1 = p_ref[ROW_BN8:ROW_BN8 + NEURONS, 1:2]
        g3 = p_ref[ROW_BN8:ROW_BN8 + NEURONS, 2:3]
        be3 = p_ref[ROW_BN8:ROW_BN8 + NEURONS, 3:4]
        b4 = p_ref[ROW_BN8:ROW_BN8 + OUT_CLASSES, 4:5]             # (4, 1)
        g2 = p_ref[ROW_BN16:ROW_BN16 + HIDDEN2, 0:1]
        be2 = p_ref[ROW_BN16:ROW_BN16 + HIDDEN2, 1:2]
        w2 = p_ref[ROW_W2:ROW_W2 + HIDDEN2, 0:NEURONS]             # (16, 8)
        w3 = p_ref[ROW_W3:ROW_W3 + NEURONS, 0:HIDDEN2]             # (8, 16)
        w4 = p_ref[ROW_W4:ROW_W4 + OUT_CLASSES, 0:NEURONS]         # (4, 8)

        # Padded batch columns must not leak into BN2/BN3 statistics.
        if b_pad != batch:
            lane_valid = (jax.lax.broadcasted_iota(jnp.int32, (1, b_pad), 1)
                          < batch)
        else:
            lane_valid = None

        def mask_pad(a):
            return a if lane_valid is None else jnp.where(lane_valid, a, 0.0)

        def bn_affine(mean, var, gamma, beta):
            # Folded scale/shift: 2 VPU ops per element instead of 4.
            scale = gamma * jax.lax.rsqrt(var + BN_EPS)
            return scale, beta - mean * scale

        # BN1 + Sigmoid from the streamed sums (biased variance, fused form).
        mean1 = s1_ref[...] * inv_b
        var1 = jnp.maximum(ss1_ref[...] * inv_b - mean1 * mean1, 0.0)
        sc1, sh1 = bn_affine(mean1, var1, g1, be1)
        a1 = mask_pad(jax.nn.sigmoid(h1_ref[...] * sc1 + sh1))      # (8, B_pad)

        def bn_sigmoid(h, gamma, beta):
            mean = jnp.sum(h, axis=1, keepdims=True) * inv_b
            mean_sq = jnp.sum(h * h, axis=1, keepdims=True) * inv_b
            var = jnp.maximum(mean_sq - mean * mean, 0.0)
            scale, shift = bn_affine(mean, var, gamma, beta)
            return mask_pad(jax.nn.sigmoid(h * scale + shift))

        h2 = jnp.dot(w2, a1, preferred_element_type=jnp.float32)    # (16, B_pad)
        a2 = bn_sigmoid(h2, g2, be2)
        h3 = jnp.dot(w3, a2, preferred_element_type=jnp.float32)    # (8, B_pad)
        a3 = bn_sigmoid(h3, g3, be3)

        # Head: Linear(8->4) + bias + LogSoftmax over features (sublane axis).
        logits = jnp.dot(w4, a3, preferred_element_type=jnp.float32) + b4
        m = jnp.max(logits, axis=0, keepdims=True)
        shifted = logits - m
        lse = jnp.log(jnp.sum(jnp.exp(shifted), axis=0, keepdims=True))
        o_ref[...] = (shifted - lse).astype(o_ref.dtype)            # (4, B_pad)


def net_forward(x, packed_params, *, tb_max=1024):
    """x: (B, 15) f32, packed_params: (64, 16) f32.  Returns (B, 4) log-probs.

    Note: matches PyTorch training-mode BatchNorm semantics (batch stats,
    biased variance).  B == 1 is degenerate (PyTorch raises in that case).
    """
    batch = x.shape[0]
    assert x.shape[1] == IN_FEATURES and batch >= 1

    tile_b = min(_round_up(batch, 128), max(128, _round_up(tb_max, 128)))
    b_pad = _round_up(batch, tile_b)
    num_tiles = b_pad // tile_b

    x = x.astype(jnp.float32)
    if b_pad != batch:
        x = jnp.pad(x, ((0, b_pad - batch), (0, 0)))

    # Explicit scoped-VMEM budget (resident h1/out + temps + streamed tiles).
    resident = (NEURONS + 8) * b_pad * 4
    temporaries = 512 * b_pad
    streamed = 2 * tile_b * 128 * 4 + 2 * PACK_ROWS * 128 * 4
    vmem_limit = int(min(resident + temporaries + streamed + (8 << 20), 64 << 20))

    out_fb = pl.pallas_call(
        functools.partial(_net_kernel, batch=batch, tile_b=tile_b),
        out_shape=jax.ShapeDtypeStruct((OUT_CLASSES, b_pad), jnp.float32),
        grid_spec=pltpu.PrefetchScalarGridSpec(
            num_scalar_prefetch=0,
            grid=(num_tiles,),
            in_specs=[
                pl.BlockSpec((tile_b, IN_FEATURES), lambda i: (i, 0)),
                pl.BlockSpec((PACK_ROWS, PACK_COLS), lambda i: (0, 0)),
            ],
            out_specs=pl.BlockSpec((OUT_CLASSES, b_pad), lambda i: (0, 0)),
            scratch_shapes=[
                pltpu.VMEM((NEURONS, b_pad), jnp.float32),   # resident h1
                pltpu.VMEM((NEURONS, 1), jnp.float32),       # BN1 sum
                pltpu.VMEM((NEURONS, 1), jnp.float32),       # BN1 sum of squares
            ],
        ),
        compiler_params=pltpu.CompilerParams(
            dimension_semantics=("arbitrary",),   # BN needs full-batch sums
            vmem_limit_bytes=vmem_limit,
        ),
    )(x, packed_params)

    return out_fb[:, :batch].T                    # back to PyTorch (B, 4)


# ---------------------------- parameter handling ----------------------------
def _xavier_normal(key, out_f, in_f):
    std = (2.0 / (in_f + out_f)) ** 0.5
    return std * jax.random.normal(key, (out_f, in_f), dtype=jnp.float32)


def init_params(key, neurons=NEURONS):
    """Synthetic init matching the PyTorch __init__ (xavier_normal_ weights,
    bias = 0.01, BN gamma = 1 / beta = 0)."""
    hidden2 = 2 * neurons
    k1, k2, k3, k4 = jax.random.split(key, 4)
    return {
        "w1": _xavier_normal(k1, neurons, IN_FEATURES),
        "w2": _xavier_normal(k2, hidden2, neurons),
        "w3": _xavier_normal(k3, neurons, hidden2),
        "w4": _xavier_normal(k4, OUT_CLASSES, neurons),
        "b1": jnp.full((neurons,), 0.01, jnp.float32),
        "b2": jnp.full((hidden2,), 0.01, jnp.float32),
        "b3": jnp.full((neurons,), 0.01, jnp.float32),
        "b4": jnp.full((OUT_CLASSES,), 0.01, jnp.float32),
        "g1": jnp.ones((neurons,), jnp.float32),
        "be1": jnp.zeros((neurons,), jnp.float32),
        "g2": jnp.ones((hidden2,), jnp.float32),
        "be2": jnp.zeros((hidden2,), jnp.float32),
        "g3": jnp.ones((neurons,), jnp.float32),
        "be3": jnp.zeros((neurons,), jnp.float32),
    }


def pack_params(p):
    """Pack into one (64, 16) f32 slab.  b1..b3 are omitted: cancelled exactly
    by training-mode BatchNorm's batch-mean subtraction."""
    slab = jnp.zeros((PACK_ROWS, PACK_COLS), dtype=jnp.float32)
    slab = slab.at[ROW_W1:ROW_W1 + NEURONS, 0:IN_FEATURES].set(p["w1"])
    slab = slab.at[ROW_W2:ROW_W2 + HIDDEN2, 0:NEURONS].set(p["w2"])
    slab = slab.at[ROW_W3:ROW_W3 + NEURONS, 0:HIDDEN2].set(p["w3"])
    slab = slab.at[ROW_W4:ROW_W4 + OUT_CLASSES, 0:NEURONS].set(p["w4"])
    slab = slab.at[ROW_BN8:ROW_BN8 + NEURONS, 0].set(p["g1"])
    slab = slab.at[ROW_BN8:ROW_BN8 + NEURONS, 1].set(p["be1"])
    slab = slab.at[ROW_BN8:ROW_BN8 + NEURONS, 2].set(p["g3"])
    slab = slab.at[ROW_BN8:ROW_BN8 + NEURONS, 3].set(p["be3"])
    slab = slab.at[ROW_BN8:ROW_BN8 + OUT_CLASSES, 4].set(p["b4"])
    slab = slab.at[ROW_BN16:ROW_BN16 + HIDDEN2, 0].set(p["g2"])
    slab = slab.at[ROW_BN16:ROW_BN16 + HIDDEN2, 1].set(p["be2"])
    return slab


def ref_forward(x, p):
    """Pure-JAX reference with full PyTorch semantics (incl. b1..b3)."""
    def block(h, w, b, g, be):
        h = h @ w.T + b
        mean = jnp.mean(h, axis=0)
        var = jnp.mean((h - mean) ** 2, axis=0)      # biased variance
        h = (h - mean) / jnp.sqrt(var + BN_EPS) * g + be
        return jax.nn.sigmoid(h)

    h = block(x, p["w1"], p["b1"], p["g1"], p["be1"])
    h = block(h, p["w2"], p["b2"], p["g2"], p["be2"])
    h = block(h, p["w3"], p["b3"], p["g3"], p["be3"])
    logits = h @ p["w4"].T + p["b4"]
    return jax.nn.log_softmax(logits, axis=1)


if __name__ == "__main__":
    key = jax.random.PRNGKey(0)
    kx, kp = jax.random.split(key)
    params = init_params(kp)
    slab = pack_params(params)

    # (batch, tb_max): first exercises the single-tile + padded-batch path,
    # second exercises the multi-tile streamed path (2 tiles) + masking.
    for batch, tb in [(64, 1024), (200, 128)]:
        kxi = jax.random.fold_in(kx, batch)
        x = jax.random.normal(kxi, (batch, IN_FEATURES), dtype=jnp.float32)

        out = jax.block_until_ready(net_forward(x, slab, tb_max=tb))
        assert out.shape == (batch, OUT_CLASSES)
        # log-softmax rows must sum (in prob space) to ~1
        assert jnp.allclose(jnp.sum(jnp.exp(out), axis=-1), 1.0, atol=1e-5)
        # match the full PyTorch-semantics reference (incl. b1..b3)
        ref = ref_forward(x, params)
        err = float(jnp.max(jnp.abs(out - ref)))
        assert jnp.allclose(out, ref, atol=2e-4, rtol=2e-4), err

    print("KERNEL_OK")
</pallas_src>

<mosaic_0001>
module attributes {stable_mosaic.version = 11 : i64} {
  func.func @_net_kernel(%arg0: i32, %arg1: memref<128x15xf32, #tpu.memory_space<vmem>>, %arg2: memref<64x16xf32, #tpu.memory_space<vmem>>, %arg3: memref<4x128xf32, #tpu.memory_space<vmem>>, %arg4: memref<8x128xf32, #tpu.memory_space<vmem>>, %arg5: memref<8x1xf32, #tpu.memory_space<vmem>>, %arg6: memref<8x1xf32, #tpu.memory_space<vmem>>) attributes {dimension_semantics = [#tpu.dimension_semantics<arbitrary>], iteration_bounds = array<i64: 1>, scalar_prefetch = 0 : i64, scratch_operands = 3 : i64, tpu.core_type = #tpu.core_type<tc>, window_params = [{transform_indices = @transform_0, window_bounds = array<i64: 128, 15>}, {pipeline_mode = #tpu.pipeline_mode<synchronous>, transform_indices = @transform_1, window_bounds = array<i64: 64, 16>}, {pipeline_mode = #tpu.pipeline_mode<synchronous>, transform_indices = @transform_2, window_bounds = array<i64: 4, 128>}]} {
    %c0_i32 = arith.constant 0 : i32
    %0 = arith.cmpi eq, %arg0, %c0_i32 : i32
    %1 = arith.extui %0 : i1 to i32
    %c0_i32_0 = arith.constant 0 : i32
    %2 = arith.cmpi ne, %1, %c0_i32_0 : i32
    scf.if %2 {
      %cst_18 = arith.constant 0.000000e+00 : f32
      %21 = vector.broadcast %cst_18 : f32 to vector<8x1xf32>
      %c0_19 = arith.constant 0 : index
      %c0_20 = arith.constant 0 : index
      %22 = vector.load %arg5[%c0_19, %c0_20] : memref<8x1xf32, #tpu.memory_space<vmem>>, vector<8x1xf32>
      tpu.vector_store %arg5[%c0_19, %c0_20], %21 {strides = array<i32>} : memref<8x1xf32, #tpu.memory_space<vmem>>, vector<8x1xf32>,
      %cst_21 = arith.constant 0.000000e+00 : f32
      %23 = vector.broadcast %cst_21 : f32 to vector<8x1xf32>
      %c0_22 = arith.constant 0 : index
      %c0_23 = arith.constant 0 : index
      %24 = vector.load %arg6[%c0_22, %c0_23] : memref<8x1xf32, #tpu.memory_space<vmem>>, vector<8x1xf32>
      tpu.vector_store %arg6[%c0_22, %c0_23], %23 {strides = array<i32>} : memref<8x1xf32, #tpu.memory_space<vmem>>, vector<8x1xf32>,
    } else {
    }
    %c0 = arith.constant 0 : index
    %c0_1 = arith.constant 0 : index
    %3 = vector.load %arg2[%c0, %c0_1] : memref<64x16xf32, #tpu.memory_space<vmem>>, vector<8x15xf32>
    %c0_2 = arith.constant 0 : index
    %c0_3 = arith.constant 0 : index
    %4 = vector.load %arg1[%c0_2, %c0_3] : memref<128x15xf32, #tpu.memory_space<vmem>>, vector<128x15xf32>
    %cst = arith.constant dense<0.000000e+00> : vector<8x128xf32>
    %5 = tpu.matmul %3, %4, %cst {dimension_numbers = #tpu.dot_dimension_numbers<[1], [1], [0], [0], [0, 0, 1, 0], [], []>} : vector<8x15xf32>, vector<128x15xf32>, vector<8x128xf32> -> vector<8x128xf32>
    %c0_4 = arith.constant 0 : index
    %c0_5 = arith.constant 0 : index
    %6 = vector.load %arg5[%c0_4, %c0_5] : memref<8x1xf32, #tpu.memory_space<vmem>>, vector<8x1xf32>
    %cst_6 = arith.constant dense<0.000000e+00> : vector<8xf32>
    %7 = vector.multi_reduction <add>, %5, %cst_6 [1] : vector<8x128xf32> to vector<8xf32>
    %8 = vector.shape_cast %7 : vector<8xf32> to vector<8x1xf32>
    %9 = arith.addf %6, %8 : vector<8x1xf32>
    %c0_7 = arith.constant 0 : index
    %c0_8 = arith.constant 0 : index
    %10 = vector.load %arg5[%c0_7, %c0_8] : memref<8x1xf32, #tpu.memory_space<vmem>>, vector<8x1xf32>
    tpu.vector_store %arg5[%c0_7, %c0_8], %9 {strides = array<i32>} : memref<8x1xf32, #tpu.memory_space<vmem>>, vector<8x1xf32>,
    %c0_9 = arith.constant 0 : index
    %c0_10 = arith.constant 0 : index
    %11 = vector.load %arg6[%c0_9, %c0_10] : memref<8x1xf32, #tpu.memory_space<vmem>>, vector<8x1xf32>
    %12 = arith.mulf %5, %5 : vector<8x128xf32>
    %cst_11 = arith.constant dense<0.000000e+00> : vector<8xf32>
    %13 = vector.multi_reduction <add>, %12, %cst_11 [1] : vector<8x128xf32> to vector<8xf32>
    %14 = vector.shape_cast %13 : vector<8xf32> to vector<8x1xf32>
    %15 = arith.addf %11, %14 : vector<8x1xf32>
    %c0_12 = arith.constant 0 : index
    %c0_13 = arith.constant 0 : index
    %16 = vector.load %arg6[%c0_12, %c0_13] : memref<8x1xf32, #tpu.memory_space<vmem>>, vector<8x1xf32>
    tpu.vector_store %arg6[%c0_12, %c0_13], %15 {strides = array<i32>} : memref<8x1xf32, #tpu.memory_space<vmem>>, vector<8x1xf32>,
    %c0_14 = arith.constant 0 : index
    %c0_15 = arith.constant 0 : index
    %17 = vector.load %arg4[%c0_14, %c0_15] : memref<8x128xf32, #tpu.memory_space<vmem>>, vector<8x128xf32>
    tpu.vector_store %arg4[%c0_14, %c0_15], %5 {strides = array<i32>} : memref<8x128xf32, #tpu.memory_space<vmem>>, vector<8x128xf32>,
    %c0_i32_16 = arith.constant 0 : i32
    %18 = arith.cmpi eq, %arg0, %c0_i32_16 : i32
    %19 = arith.extui %18 : i1 to i32
    %c0_i32_17 = arith.constant 0 : i32
    %20 = arith.cmpi ne, %19, %c0_i32_17 : i32
    scf.if %20 {
      %c40 = arith.constant 40 : index
      %c0_18 = arith.constant 0 : index
      %21 = vector.load %arg2[%c40, %c0_18] : memref<64x16xf32, #tpu.memory_space<vmem>>, vector<8x1xf32>
      %c40_19 = arith.constant 40 : index
      %c1 = arith.constant 1 : index
      %22 = vector.load %arg2[%c40_19, %c1] : memref<64x16xf32, #tpu.memory_space<vmem>>, vector<8x1xf32>
      %c40_20 = arith.constant 40 : index
      %c2 = arith.constant 2 : index
      %23 = vector.load %arg2[%c40_20, %c2] : memref<64x16xf32, #tpu.memory_space<vmem>>, vector<8x1xf32>
      %c40_21 = arith.constant 40 : index
      %c3 = arith.constant 3 : index
      %24 = vector.load %arg2[%c40_21, %c3] : memref<64x16xf32, #tpu.memory_space<vmem>>, vector<8x1xf32>
      %c40_22 = arith.constant 40 : index
      %c4 = arith.constant 4 : index
      %25 = vector.load %arg2[%c40_22, %c4] : memref<64x16xf32, #tpu.memory_space<vmem>>, vector<4x1xf32>
      %c48 = arith.constant 48 : index
      %c0_23 = arith.constant 0 : index
      %26 = vector.load %arg2[%c48, %c0_23] : memref<64x16xf32, #tpu.memory_space<vmem>>, vector<16x1xf32>
      %c48_24 = arith.constant 48 : index
      %c1_25 = arith.constant 1 : index
      %27 = vector.load %arg2[%c48_24, %c1_25] : memref<64x16xf32, #tpu.memory_space<vmem>>, vector<16x1xf32>
      %c8 = arith.constant 8 : index
      %c0_26 = arith.constant 0 : index
      %28 = vector.load %arg2[%c8, %c0_26] : memref<64x16xf32, #tpu.memory_space<vmem>>, vector<16x8xf32>
      %c24 = arith.constant 24 : index
      %c0_27 = arith.constant 0 : index
      %29 = vector.load %arg2[%c24, %c0_27] : memref<64x16xf32, #tpu.memory_space<vmem>>, vector<8x16xf32>
      %c32 = arith.constant 32 : index
      %c0_28 = arith.constant 0 : index
      %30 = vector.load %arg2[%c32, %c0_28] : memref<64x16xf32, #tpu.memory_space<vmem>>, vector<4x8xf32>
      %31 = tpu.iota {dimensions = array<i32: 1>} : vector<1x128xi32>
      %c64_i32 = arith.constant 64 : i32
      %32 = vector.broadcast %c64_i32 : i32 to vector<1x128xi32>
      %33 = arith.cmpi slt, %31, %32 : vector<1x128xi32>
      %c0_29 = arith.constant 0 : index
      %c0_30 = arith.constant 0 : index
      %34 = vector.load %arg5[%c0_29, %c0_30] : memref<8x1xf32, #tpu.memory_space<vmem>>, vector<8x1xf32>
      %cst_31 = arith.constant 1.562500e-02 : f32
      %35 = vector.broadcast %cst_31 : f32 to vector<8x1xf32>
      %36 = arith.mulf %34, %35 : vector<8x1xf32>
      %c0_32 = arith.constant 0 : index
      %c0_33 = arith.constant 0 : index
      %37 = vector.load %arg6[%c0_32, %c0_33] : memref<8x1xf32, #tpu.memory_space<vmem>>, vector<8x1xf32>
      %cst_34 = arith.constant 1.562500e-02 : f32
      %38 = vector.broadcast %cst_34 : f32 to vector<8x1xf32>
      %39 = arith.mulf %37, %38 : vector<8x1xf32>
      %40 = arith.mulf %36, %36 : vector<8x1xf32>
      %41 = arith.subf %39, %40 : vector<8x1xf32>
      %cst_35 = arith.constant 0.000000e+00 : f32
      %42 = vector.broadcast %cst_35 : f32 to vector<8x1xf32>
      %43 = arith.maximumf %41, %42 : vector<8x1xf32>
      %cst_36 = arith.constant 9.99999974E-6 : f32
      %44 = vector.broadcast %cst_36 : f32 to vector<8x1xf32>
      %45 = arith.addf %43, %44 : vector<8x1xf32>
      %46 = math.rsqrt %45 : vector<8x1xf32>
      %47 = arith.mulf %21, %46 : vector<8x1xf32>
      %48 = arith.mulf %36, %47 : vector<8x1xf32>
      %49 = arith.subf %22, %48 : vector<8x1xf32>
      %c0_37 = arith.constant 0 : index
      %c0_38 = arith.constant 0 : index
      %50 = vector.load %arg4[%c0_37, %c0_38] : memref<8x128xf32, #tpu.memory_space<vmem>>, vector<8x128xf32>
      %51 = vector.broadcast %47 : vector<8x1xf32> to vector<8x128xf32>
      %52 = arith.mulf %50, %51 : vector<8x128xf32>
      %53 = vector.broadcast %49 : vector<8x1xf32> to vector<8x128xf32>
      %54 = arith.addf %52, %53 : vector<8x128xf32>
      %55 = arith.negf %54 : vector<8x128xf32>
      %56 = math.exp %55 : vector<8x128xf32>
      %cst_39 = arith.constant 1.000000e+00 : f32
      %57 = vector.broadcast %cst_39 : f32 to vector<8x128xf32>
      %58 = arith.addf %57, %56 : vector<8x128xf32>
      %59 = arith.divf %57, %58 : vector<8x128xf32>
      %cst_40 = arith.constant 0.000000e+00 : f32
      %60 = vector.shape_cast %33 : vector<1x128xi1> to vector<1x128xi1>
      %61 = vector.broadcast %60 : vector<1x128xi1> to vector<8x128xi1>
      %62 = vector.broadcast %cst_40 : f32 to vector<8x128xf32>
      %63 = arith.select %61, %59, %62 : vector<8x128xi1>, vector<8x128xf32>
      %cst_41 = arith.constant dense<0.000000e+00> : vector<16x128xf32>
      %64 = tpu.matmul %28, %63, %cst_41 {dimension_numbers = #tpu.dot_dimension_numbers<[1], [0], [0], [1], [0, 0, 1, 1], [], []>} : vector<16x8xf32>, vector<8x128xf32>, vector<16x128xf32> -> vector<16x128xf32>
      %cst_42 = arith.constant dense<0.000000e+00> : vector<16xf32>
      %65 = vector.multi_reduction <add>, %64, %cst_42 [1] : vector<16x128xf32> to vector<16xf32>
      %66 = vector.shape_cast %65 : vector<16xf32> to vector<16x1xf32>
      %cst_43 = arith.constant 1.562500e-02 : f32
      %67 = vector.broadcast %cst_43 : f32 to vector<16x1xf32>
      %68 = arith.mulf %66, %67 : vector<16x1xf32>
      %69 = arith.mulf %64, %64 : vector<16x128xf32>
      %cst_44 = arith.constant dense<0.000000e+00> : vector<16xf32>
      %70 = vector.multi_reduction <add>, %69, %cst_44 [1] : vector<16x128xf32> to vector<16xf32>
      %71 = vector.shape_cast %70 : vector<16xf32> to vector<16x1xf32>
      %cst_45 = arith.constant 1.562500e-02 : f32
      %72 = vector.broadcast %cst_45 : f32 to vector<16x1xf32>
      %73 = arith.mulf %71, %72 : vector<16x1xf32>
      %74 = arith.mulf %68, %68 : vector<16x1xf32>
      %75 = arith.subf %73, %74 : vector<16x1xf32>
      %cst_46 = arith.constant 0.000000e+00 : f32
      %76 = vector.broadcast %cst_46 : f32 to vector<16x1xf32>
      %77 = arith.maximumf %75, %76 : vector<16x1xf32>
      %cst_47 = arith.constant 9.99999974E-6 : f32
      %78 = vector.broadcast %cst_47 : f32 to vector<16x1xf32>
      %79 = arith.addf %77, %78 : vector<16x1xf32>
      %80 = math.rsqrt %79 : vector<16x1xf32>
      %81 = arith.mulf %26, %80 : vector<16x1xf32>
      %82 = arith.mulf %68, %81 : vector<16x1xf32>
      %83 = arith.subf %27, %82 : vector<16x1xf32>
      %84 = vector.broadcast %81 : vector<16x1xf32> to vector<16x128xf32>
      %85 = arith.mulf %64, %84 : vector<16x128xf32>
      %86 = vector.broadcast %83 : vector<16x1xf32> to vector<16x128xf32>
      %87 = arith.addf %85, %86 : vector<16x128xf32>
      %88 = arith.negf %87 : vector<16x128xf32>
      %89 = math.exp %88 : vector<16x128xf32>
      %cst_48 = arith.constant 1.000000e+00 : f32
      %90 = vector.broadcast %cst_48 : f32 to vector<16x128xf32>
      %91 = arith.addf %90, %89 : vector<16x128xf32>
      %92 = arith.divf %90, %91 : vector<16x128xf32>
      %cst_49 = arith.constant 0.000000e+00 : f32
      %93 = vector.shape_cast %33 : vector<1x128xi1> to vector<1x128xi1>
      %94 = vector.broadcast %93 : vector<1x128xi1> to vector<16x128xi1>
      %95 = vector.broadcast %cst_49 : f32 to vector<16x128xf32>
      %96 = arith.select %94, %92, %95 : vector<16x128xi1>, vector<16x128xf32>
      %cst_50 = arith.constant dense<0.000000e+00> : vector<8x128xf32>
      %97 = tpu.matmul %29, %96, %cst_50 {dimension_numbers = #tpu.dot_dimension_numbers<[1], [0], [0], [1], [0, 0, 1, 1], [], []>} : vector<8x16xf32>, vector<16x128xf32>, vector<8x128xf32> -> vector<8x128xf32>
      %cst_51 = arith.constant dense<0.000000e+00> : vector<8xf32>
      %98 = vector.multi_reduction <add>, %97, %cst_51 [1] : vector<8x128xf32> to vector<8xf32>
      %99 = vector.shape_cast %98 : vector<8xf32> to vector<8x1xf32>
      %cst_52 = arith.constant 1.562500e-02 : f32
      %100 = vector.broadcast %cst_52 : f32 to vector<8x1xf32>
      %101 = arith.mulf %99, %100 : vector<8x1xf32>
      %102 = arith.mulf %97, %97 : vector<8x128xf32>
      %cst_53 = arith.constant dense<0.000000e+00> : vector<8xf32>
      %103 = vector.multi_reduction <add>, %102, %cst_53 [1] : vector<8x128xf32> to vector<8xf32>
      %104 = vector.shape_cast %103 : vector<8xf32> to vector<8x1xf32>
      %cst_54 = arith.constant 1.562500e-02 : f32
      %105 = vector.broadcast %cst_54 : f32 to vector<8x1xf32>
      %106 = arith.mulf %104, %105 : vector<8x1xf32>
      %107 = arith.mulf %101, %101 : vector<8x1xf32>
      %108 = arith.subf %106, %107 : vector<8x1xf32>
      %cst_55 = arith.constant 0.000000e+00 : f32
      %109 = vector.broadcast %cst_55 : f32 to vector<8x1xf32>
      %110 = arith.maximumf %108, %109 : vector<8x1xf32>
      %cst_56 = arith.constant 9.99999974E-6 : f32
      %111 = vector.broadcast %cst_56 : f32 to vector<8x1xf32>
      %112 = arith.addf %110, %111 : vector<8x1xf32>
      %113 = math.rsqrt %112 : vector<8x1xf32>
      %114 = arith.mulf %23, %113 : vector<8x1xf32>
      %115 = arith.mulf %101, %114 : vector<8x1xf32>
      %116 = arith.subf %24, %115 : vector<8x1xf32>
      %117 = vector.broadcast %114 : vector<8x1xf32> to vector<8x128xf32>
      %118 = arith.mulf %97, %117 : vector<8x128xf32>
      %119 = vector.broadcast %116 : vector<8x1xf32> to vector<8x128xf32>
      %120 = arith.addf %118, %119 : vector<8x128xf32>
      %121 = arith.negf %120 : vector<8x128xf32>
      %122 = math.exp %121 : vector<8x128xf32>
      %cst_57 = arith.constant 1.000000e+00 : f32
      %123 = vector.broadcast %cst_57 : f32 to vector<8x128xf32>
      %124 = arith.addf %123, %122 : vector<8x128xf32>
      %125 = arith.divf %123, %124 : vector<8x128xf32>
      %cst_58 = arith.constant 0.000000e+00 : f32
      %126 = vector.shape_cast %33 : vector<1x128xi1> to vector<1x128xi1>
      %127 = vector.broadcast %126 : vector<1x128xi1> to vector<8x128xi1>
      %128 = vector.broadcast %cst_58 : f32 to vector<8x128xf32>
      %129 = arith.select %127, %125, %128 : vector<8x128xi1>, vector<8x128xf32>
      %cst_59 = arith.constant dense<0.000000e+00> : vector<4x128xf32>
      %130 = tpu.matmul %30, %129, %cst_59 {dimension_numbers = #tpu.dot_dimension_numbers<[1], [0], [0], [1], [0, 0, 1, 1], [], []>} : vector<4x8xf32>, vector<8x128xf32>, vector<4x128xf32> -> vector<4x128xf32>
      %131 = vector.broadcast %25 : vector<4x1xf32> to vector<4x128xf32>
      %132 = arith.addf %130, %131 : vector<4x128xf32>
      %cst_60 = arith.constant dense<0xFF800000> : vector<128xf32>
      %133 = vector.multi_reduction <maximumf>, %132, %cst_60 [0] : vector<4x128xf32> to vector<128xf32>
      %134 = vector.shape_cast %133 : vector<128xf32> to vector<1x128xf32>
      %135 = vector.broadcast %134 : vector<1x128xf32> to vector<4x128xf32>
      %136 = arith.subf %132, %135 : vector<4x128xf32>
      %137 = math.exp %136 : vector<4x128xf32>
      %cst_61 = arith.constant dense<0.000000e+00> : vector<128xf32>
      %138 = vector.multi_reduction <add>, %137, %cst_61 [0] : vector<4x128xf32> to vector<128xf32>
      %139 = vector.shape_cast %138 : vector<128xf32> to vector<1x128xf32>
      %140 = math.log %139 : vector<1x128xf32>
      %141 = vector.broadcast %140 : vector<1x128xf32> to vector<4x128xf32>
      %142 = arith.subf %136, %141 : vector<4x128xf32>
      %c0_62 = arith.constant 0 : index
      %c0_63 = arith.constant 0 : index
      %143 = vector.load %arg3[%c0_62, %c0_63] : memref<4x128xf32, #tpu.memory_space<vmem>>, vector<4x128xf32>
      tpu.vector_store %arg3[%c0_62, %c0_63], %142 {strides = array<i32>} : memref<4x128xf32, #tpu.memory_space<vmem>>, vector<4x128xf32>,
    } else {
    }
    return
  }
  func.func @transform_0(%arg0: i32) -> (i32, i32) {
    %c0_i32 = arith.constant 0 : i32
    %c0_i32_0 = arith.constant 0 : i32
    return %arg0, %c0_i32 : i32, i32
  }
  func.func @transform_1(%arg0: i32) -> (i32, i32) {
    %c0_i32 = arith.constant 0 : i32
    %c0_i32_0 = arith.constant 0 : i32
    %c0_i32_1 = arith.constant 0 : i32
    return %c0_i32, %c0_i32_0 : i32, i32
  }
  func.func @transform_2(%arg0: i32) -> (i32, i32) {
    %c0_i32 = arith.constant 0 : i32
    %c0_i32_0 = arith.constant 0 : i32
    %c0_i32_1 = arith.constant 0 : i32
    return %c0_i32, %c0_i32_0 : i32, i32
  }
}

</mosaic_0001>

<bundles_post_ra>
// kernel: tpu_custom_call.1
= control target key start
LH: loop header
LB: loop body
LE: loop exit
PB: predicated region body
PF: predicated region fallthrough
CT: control target
= control target key end

     0   :  { %vm36_vm0 = vcmask 121856   ;;  %v818_v2 = vmov 0.0|0.0   ;;  %vm819_vm2 = vmmov 0   ;;  %v820_v5 = vmov 0.0   ;;  %s998_s0 = inlined_call_operand.vmem [shape: f32[128,15], index: 0, kind: input, shape index: {}]   ;;  %s999_s1 = inlined_call_operand.vmem [shape: f32[64,16], index: 1, kind: input, shape index: {}]   ;;  %s1000_s2 = inlined_call_operand.hbm [shape: f32[4,128], index: 2, kind: output, shape index: {}]  }
   0x1   :  { %v20_v0 = vld [vmem:[%s998_s0] sm:$0xff]  ;;  %v21_v1 = vld [vmem:[%s998_s0 + $0x8] sm:$0xff]  ;;  %713 = vmatprep.subr.bf16.mxu0 %v818_v2  ;;  %vm852_vm1 = vmpackc.low %vm36_vm0, %vm36_vm0  ;;  %693 = vmatprep.mubr.msk.f32.mxu0 %vm819_vm2, %v820_v5 }
   0x2   :  { %v714_v3 = vpack.c.bf16 %v21_v1, %v20_v0  ;;  %v22_v6 = vld [vmem:[%s998_s0 + $0x10] sm:$0xff]  ;;  %v23_v7 = vld [vmem:[%s998_s0 + $0x18] sm:$0xff] }
   0x4   :  { %716 = vmatpush3.bf16.xpose.msk.msra.mxu0 %vm852_vm1, %v714_v3 }
   0x5   :  { %717 = vmatprep.subr.bf16.mxu0 %v818_v2 }
   0x6   :  { %7 = vsyncpa [#allocation6], 0  ;;  %v718_v8 = vpack.c.bf16 %v23_v7, %v22_v6  ;;  %v24_v9 = vld [vmem:[%s998_s0 + $0x20] sm:$0xff]  ;;  %v25_v10 = vld [vmem:[%s998_s0 + $0x28] sm:$0xff]  ;;  %vm16_vm3 = vcmask 7168   ;;  %v821_v31 = vmov 0   ;;  %v182_v61 = vlaneseq }
   0x7   :  { %v722_v11 = vpack.c.bf16 %v25_v10, %v24_v9  ;;  %v26_v12 = vld [vmem:[%s998_s0 + $0x30] sm:$0xff]  ;;  %v27_v13 = vld [vmem:[%s998_s0 + $0x38] sm:$0xff]  ;;  %v28_v15 = vld [vmem:[%s998_s0 + $0x40] sm:$0xff]  ;;  %17 = vst.msk [vmem:[#allocation3] sm:$0xff] %vm16_vm3, %v820_v5  ;;  %759 = vset.pattern.permute.xlu1 %v821_v31  ;;  %v822_v46 = vmov 1   ;;  %s823_s16 = smov 1  }
   0x8   :  { %v726_v14 = vpack.c.bf16 %v27_v13, %v26_v12  ;;  %v29_v16 = vld [vmem:[%s998_s0 + $0x48] sm:$0xff]  ;;  %v30_v18 = vld [vmem:[%s998_s0 + $0x50] sm:$0xff]  ;;  %v31_v19 = vld [vmem:[%s998_s0 + $0x58] sm:$0xff]  ;;  %18 = vst.msk [vmem:[#allocation4] sm:$0xff] %vm16_vm3, %v820_v5  ;;  %760 = vset.pattern.permute.xlu0 %v822_v46  ;;  %vm223_vm4 = vcmask 64512   ;;  %v942_v62 = vand.u32 127, %v182_v61 }
   0x9   :  { %v730_v17 = vpack.c.bf16 %v29_v16, %v28_v15  ;;  %v734_v20 = vpack.c.bf16 %v31_v19, %v30_v18  ;;  %v32_v21 = vld [vmem:[%s998_s0 + $0x60] sm:$0xff]  ;;  %v33_v22 = vld [vmem:[%s998_s0 + $0x68] sm:$0xff]  ;;  %v34_v24 = vld [vmem:[%s998_s0 + $0x70] sm:$0xff]  ;;  %vm381_vm7 = vcmask 130048   ;;  %vm571_vm8 = vcmask 1043456  }
   0xa   :  { %v738_v23 = vpack.c.bf16 %v33_v22, %v32_v21  ;;  %v35_v25 = vld [vmem:[%s998_s0 + $0x78] sm:$0xff]  ;;  %v19_v27 = vld [vmem:[%s999_s1] sm:$0xff]  ;;  %v933_v47 = vld [vmem:[%s999_s1 + $0x28] sm:$0xff]  ;;  %vm184_vm5 = vcmp.lt.s32.totalorder %v942_v62, 64 }
   0xb   :  { %v742_v26 = vpack.c.bf16 %v35_v25, %v34_v24  ;;  %v178_v53 = vld [vmem:[%s999_s1 + $0x8] sm:$0xff]  ;;  %v179_v0 = vld [vmem:[%s999_s1 + $0x10] sm:$0xff]  ;;  %v177_v25 = vld [vmem:[%s999_s1 + $0x38] sm:$0xff] }
   0xc   :  { %720 = vmatpush3.bf16.xpose.msk.msra.mxu0 %vm852_vm1, %v718_v8  ;;  %698 = vmatprep.mubr.msk.f32.mxu1 %vm223_vm4, %v178_v53  ;;  %v176_v22 = vld [vmem:[%s999_s1 + $0x30] sm:$0xff]  ;;  %vm747_vm6 = vmpackc.low %vm184_vm5, %vm184_vm5 }
   0xd   :  { %721 = vmatprep.subr.bf16.mxu0 %v818_v2 }
   0xe   :  { %v158_v32 = vld [vmem:[#allocation3] sm:$0xff] }
   0xf   :  { %v164_v35 = vld [vmem:[#allocation4] sm:$0xff] }
  0x14   :  { %724 = vmatpush3.bf16.xpose.msk.msra.mxu0 %vm852_vm1, %v722_v11 }
  0x15   :  { %725 = vmatprep.subr.bf16.mxu0 %v818_v2 }
  0x1c   :  { %728 = vmatpush3.bf16.xpose.msk.msra.mxu0 %vm852_vm1, %v726_v14 }
  0x1d   :  { %729 = vmatprep.subr.bf16.mxu0 %v818_v2 }
  0x24   :  { %732 = vmatpush3.bf16.xpose.msk.msra.mxu0 %vm852_vm1, %v730_v17 }
  0x25   :  { %733 = vmatprep.subr.bf16.mxu0 %v818_v2 }
  0x2c   :  { %736 = vmatpush3.bf16.xpose.msk.msra.mxu0 %vm852_vm1, %v734_v20 }
  0x2d   :  { %737 = vmatprep.subr.bf16.mxu0 %v818_v2 }
  0x34   :  { %740 = vmatpush3.bf16.xpose.msk.msra.mxu0 %vm852_vm1, %v738_v23 }
  0x35   :  { %741 = vmatprep.subr.bf16.mxu0 %v818_v2 }
  0x3c   :  { %744 = vmatpush3.bf16.xpose.msk.msra.mxu0 %vm852_vm1, %v742_v26 }
  0x43   :  { %694 = vmatmul.mubr.msk.f32.vlgmr.msra.gmra.mrb[0].mxu0 %vm36_vm0, %v19_v27 }
 0x116   :  { %v154_v28 = vpop.f32.mrb[0].mxu0 }
 0x117   :  { %159 = vadd.xlane.f32.xlu0 %v154_v28  ;;  %v695_v29 = vpop.f32.mrb[1].mxu0  ;;  %v165_v30 = vmul.f32 %v154_v28, %v154_v28 }
 0x11b   :  { %166 = vadd.xlane.f32.xlu0 %v165_v30 }
 0x1a4   :  { %v160_v33 = vpop.xlane.xlu0 %159 }
 0x1a5   :  { %v161_v34 = vadd.f32 %v160_v33, %v158_v32 }
 0x1a7   :  { %163 = vst.msk [vmem:[#allocation3] sm:$0xff] %vm16_vm3, %v161_v34 }
 0x1a8   :  { %v167_v36 = vpop.xlane.xlu0 %166 }
 0x1a9   :  { %v168_v37 = vadd.f32 %v167_v36, %v164_v35 }
 0x1ab   :  { %169 = vst.msk [vmem:[#allocation4] sm:$0xff] %vm16_vm3, %v168_v37 }
 0x1ae   :  { %v185_v38 = vld [vmem:[#allocation3] sm:$0xff] }
 0x1af   :  { %v186_v39 = vmul.f32 0.015625, %v185_v38 }
 0x1b1   :  { %v189_v42 = vmul.f32 %v186_v39, %v186_v39 }
 0x1b2   :  { %v187_v40 = vld [vmem:[#allocation4] sm:$0xff] }
 0x1b3   :  { %v188_v41 = vmul.f32 0.015625, %v187_v40 }
 0x1b5   :  { %v190_v43 = vsub.f32 %v188_v41, %v189_v42 }
 0x1b7   :  { %v191_v44 = vmax.f32 %v190_v43, 0.0 }
 0x1b9   :  { %v192_v45 = vadd.f32 1e-05, %v191_v44 }
 0x1bb   :  { %766 = vrsqrt.f32 %v192_v45 }
 0x1c5   :  { %v767_v48 = vpop.eup %766 }
 0x1c6   :  { %v194_v49 = vmul.f32 %v767_v48, %v933_v47 }
 0x1c8   :  { %v195_v50 = vmul.f32 %v194_v49, %v186_v39 }
 0x1ca   :  { %197 = vrot.lane.b32.xlu1 %v195_v50, %s823_s16 }
 0x1ce   :  { %204 = vperm.xlu1 %759, %v194_v49  }
 0x23c   :  { %v198_v51 = vpop.permute.xlu1 %197 }
 0x23d   :  { %v200_v52 = vsub.f32 %v933_v47, %v198_v51 }
 0x23f   :  { %210 = vperm.xlu0 %760, %v200_v52   ;;  %v180_v52 = vld [vmem:[%s999_s1 + $0x18] sm:$0xff] }
 0x24d   :  { %v205_v54 = vpop.permute.xlu1 %204 }
 0x24e   :  { %v207_v55 = vmul.f32 %v205_v54, %v154_v28 }
 0x2be   :  { %v211_v56 = vpop.permute.xlu0 %210 }
 0x2bf   :  { %v213_v57 = vadd.f32 %v211_v56, %v207_v55  ;;  %v824_v56 = vmov 2  }
 0x2c1   :  { %v624_v58 = vmul.f32 -1.442695, %v213_v57 }
 0x2c3   :  { %768 = vpow2.f32 %v624_v58 }
 0x2cd   :  { %v769_v59 = vpop.eup %768 }
 0x2ce   :  { %v217_v60 = vadd.f32 1.0, %v769_v59 }
 0x2d0   :  { %770 = vrcp.f32 %v217_v60 }
 0x2da   :  { %v771_v63 = vpop.eup %770 }
 0x2db   :  { %696 = vmatprep.subr.msk.mxu1 %vm184_vm5, %v771_v63 }
 0x2dc   :  { %697 = vmatpush3.msk.msra.mxu1 %vm184_vm5, %v771_v63 }
 0x2dd   :  { %699 = vmatmul.mubr.msk.f32.vlgmr.msra.gmra.mrb[0].mxu1 %vm223_vm4, %v179_v0  ;;  %745 = vmatprep.subr.bf16.mxu1 %v818_v2 }
 0x2de   :  { %705 = vmatprep.mubr.msk.f32.mxu1 %vm819_vm2, %v820_v5 }
 0x3b0   :  { %v700_v1 = vpop.f32.mrb[0].mxu1 }
 0x3b1   :  { %307 = vadd.xlane.f32.xlu1 %v700_v1  ;;  %v296_v3 = vpop.f32.mrb[1].mxu1  ;;  %v312_v4 = vmul.f32 %v700_v1, %v700_v1 }
 0x3b2   :  { %v311_v6 = vmul.f32 %v296_v3, %v296_v3 }
 0x3b3   :  { %315 = vadd.xlane.f32.xlu0 %v312_v4 }
 0x3b5   :  { %305 = vadd.xlane.f32.xlu1 %v296_v3 }
 0x3b9   :  { %313 = vadd.xlane.f32.xlu1 %v311_v6 }
 0x43e   :  { %v308_v7 = vpop.xlane.xlu1 %307 }
 0x43f   :  { %v310_v8 = vmul.f32 0.015625, %v308_v7 }
 0x440   :  { %v316_v9 = vpop.xlane.xlu0 %315 }
 0x441   :  { %v320_v10 = vmul.f32 %v310_v8, %v310_v8  ;;  %v318_v11 = vmul.f32 0.015625, %v316_v9  ;;  %v175_v9 = vld [vmem:[%s999_s1 + $0x28] sm:$0xf] }
 0x442   :  { %v306_v12 = vpop.xlane.xlu1 %305 }
 0x443   :  { %v322_v13 = vsub.f32 %v318_v11, %v320_v10  ;;  %v309_v14 = vmul.f32 0.015625, %v306_v12  ;;  %v826_v10 = vmov 4  }
 0x445   :  { %v324_v2 = vmax.f32 %v322_v13, 0.0  ;;  %v319_v16 = vmul.f32 %v309_v14, %v309_v14 }
 0x446   :  { %v314_v15 = vpop.xlane.xlu1 %313 }
 0x447   :  { %v317_v17 = vmul.f32 0.015625, %v314_v15  ;;  %v326_v19 = vadd.f32 1e-05, %v324_v2 }
 0x449   :  { %v321_v18 = vsub.f32 %v317_v17, %v319_v16  ;;  %772 = vrsqrt.f32 %v326_v19 }
 0x44b   :  { %v323_v20 = vmax.f32 %v321_v18, 0.0 }
 0x44d   :  { %v325_v21 = vadd.f32 1e-05, %v323_v20 }
 0x44f   :  { %774 = vrsqrt.f32 %v325_v21 }
 0x453   :  { %v773_v23 = vpop.eup %772 }
 0x454   :  { %v330_v28 = vmul.f32 %v773_v23, %v177_v25 }
 0x456   :  { %v332_v29 = vmul.f32 %v330_v28, %v310_v8 }
 0x459   :  { %v775_v24 = vpop.eup %774 }
 0x45a   :  { %v329_v26 = vmul.f32 %v775_v24, %v176_v22 }
 0x45c   :  { %v331_v27 = vmul.f32 %v329_v26, %v309_v14 }
 0x45e   :  { %335 = vrot.lane.b32.xlu1 %v331_v27, %s823_s16 }
 0x462   :  { %337 = vrot.lane.b32.xlu1 %v332_v29, %s823_s16 }
 0x466   :  { %345 = vperm.xlu1 %759, %v329_v26  }
 0x46a   :  { %350 = vperm.xlu1 %759, %v330_v28  }
 0x46e   :  { %761 = vset.pattern.permute.xlu1 %v822_v46 }
 0x4d0   :  { %v336_v30 = vpop.permute.xlu1 %335 }
 0x4d1   :  { %v341_v31 = vsub.f32 %v176_v22, %v336_v30 }
 0x4d3   :  { %357 = vperm.xlu1 %761, %v341_v31  }
 0x4d4   :  { %v338_v32 = vpop.permute.xlu1 %337 }
 0x4d5   :  { %v342_v33 = vsub.f32 %v177_v25, %v338_v32 }
 0x4d7   :  { %362 = vperm.xlu0 %760, %v342_v33  }
 0x4db   :  { %762 = vset.pattern.permute.xlu0 %v824_v56 }
 0x4e5   :  { %v346_v34 = vpop.permute.xlu1 %345 }
 0x4e6   :  { %v353_v36 = vmul.f32 %v346_v34, %v296_v3  ;;  %v825_v3 = vmov 3  }
 0x4e7   :  { %763 = vset.pattern.permute.xlu1 %v825_v3 }
 0x4e9   :  { %v351_v35 = vpop.permute.xlu1 %350 }
 0x4ea   :  { %v354_v39 = vmul.f32 %v700_v1, %v351_v35 }
 0x552   :  { %v358_v37 = vpop.permute.xlu1 %357 }
 0x553   :  { %v365_v38 = vadd.f32 %v358_v37, %v353_v36 }
 0x555   :  { %v628_v40 = vmul.f32 -1.442695, %v365_v38 }
 0x556   :  { %v363_v41 = vpop.permute.xlu0 %362 }
 0x557   :  { %776 = vpow2.f32 %v628_v40  ;;  %v366_v42 = vadd.f32 %v363_v41, %v354_v39 }
 0x559   :  { %v629_v43 = vmul.f32 -1.442695, %v366_v42 }
 0x55b   :  { %778 = vpow2.f32 %v629_v43 }
 0x561   :  { %v777_v44 = vpop.eup %776 }
 0x562   :  { %v373_v45 = vadd.f32 1.0, %v777_v44 }
 0x564   :  { %780 = vrcp.f32 %v373_v45 }
 0x565   :  { %v779_v46 = vpop.eup %778 }
 0x566   :  { %v374_v48 = vadd.f32 1.0, %v779_v46 }
 0x568   :  { %782 = vrcp.f32 %v374_v48 }
 0x56e   :  { %v781_v49 = vpop.eup %780 }
 0x572   :  { %v783_v50 = vpop.eup %782 }
 0x573   :  { %v746_v51 = vpack.c.bf16 %v783_v50, %v781_v49 }
 0x575   :  { %748 = vmatpush3.bf16.msk.msra.mxu1 %vm747_vm6, %v746_v51 }
 0x576   :  { %708 = vmatprep.subr.mxu1 %v820_v5 }
 0x578   :  { %706 = vmatmul.mubr.msk.f32.vlgmr.msra.gmra.mrb[2].mxu1 %vm381_vm7, %v180_v52 }
 0x579   :  { %710 = vmatprep.mubr.msk.f32.mxu1 %vm819_vm2, %v820_v5 }
 0x64b   :  { %v451_v53 = vpop.f32.mrb[2].mxu1 }
 0x64c   :  { %455 = vadd.xlane.f32.xlu1 %v451_v53  ;;  %v707_v54 = vpop.f32.mrb[3].mxu1  ;;  %v458_v55 = vmul.f32 %v451_v53, %v451_v53 }
 0x64e   :  { %459 = vadd.xlane.f32.xlu0 %v458_v55 }
 0x6d9   :  { %v456_v57 = vpop.xlane.xlu1 %455 }
 0x6da   :  { %v457_v58 = vmul.f32 0.015625, %v456_v57 }
 0x6db   :  { %v460_v59 = vpop.xlane.xlu0 %459 }
 0x6dc   :  { %v462_v60 = vmul.f32 %v457_v58, %v457_v58  ;;  %v461_v61 = vmul.f32 0.015625, %v460_v59 }
 0x6de   :  { %v463_v63 = vsub.f32 %v461_v61, %v462_v60 }
 0x6e0   :  { %v464_v0 = vmax.f32 %v463_v63, 0.0 }
 0x6e2   :  { %v465_v1 = vadd.f32 1e-05, %v464_v0 }
 0x6e4   :  { %784 = vrsqrt.f32 %v465_v1 }
 0x6ee   :  { %v785_v4 = vpop.eup %784 }
 0x6ef   :  { %v467_v5 = vmul.f32 %v785_v4, %v933_v47 }
 0x6f1   :  { %476 = vperm.xlu0 %762, %v467_v5   ;;  %v468_v6 = vmul.f32 %v467_v5, %v457_v58 }
 0x6f3   :  { %470 = vrot.lane.b32.xlu1 %v468_v6, %s823_s16 }
 0x6f5   :  { %765 = vset.pattern.permute.xlu0 %v826_v10 }
 0x765   :  { %v471_v7 = vpop.permute.xlu1 %470 }
 0x766   :  { %v473_v8 = vsub.f32 %v933_v47, %v471_v7  ;;  %v181_v47 = vld [vmem:[%s999_s1 + $0x20] sm:$0xf]  ;;  %s827_s1 = smov [#allocation5]  }
 0x767   :  { %s599_s3 = sshll.u32 %s827_s1, 4  ;;  %s600_s3 = int_to_ptr.vmem [resolvable:$true] %s599_s3 }
 0x768   :  { %482 = vperm.xlu1 %763, %v473_v8   ;;  %s794_s4 = scalar_lea.vmem %s600_s3, 64  ;;  %p799_p1 = scmp.lt.s32.totalorder %s600_s3, %s600_s3 }
 0x769   :  { %p795_p0 = scmp.ne.s32.totalorder %s600_s3, %s794_s4  ;;  %p800_p2 = scmp.lt.s32.totalorder %s794_s4, %s794_s4 }
 0x76b   :  { %p801_p3 = por %p800_p2, %p799_p1 }
 0x76c   :  { %764 = vset.pattern.permute.xlu1 %v826_v10 }
 0x76d   :  { %495 = vperm.xlu1 %764, %v175_v9   ;;  %p802_p4 = pnand %p801_p3, %p795_p0 }
 0x770   :  { %v477_v11 = vpop.permute.xlu0 %476 }
 0x771   :  { %v479_v12 = vmul.f32 %v477_v11, %v451_v53 }
 0x7e7   :  { %v483_v13 = vpop.permute.xlu1 %482 }
 0x7e8   :  { %v485_v14 = vadd.f32 %v483_v13, %v479_v12 }
 0x7ea   :  { %v633_v2 = vmul.f32 -1.442695, %v485_v14 }
 0x7ec   :  { %786 = vpow2.f32 %v633_v2  ;;  %v496_v18 = vpop.permute.xlu1 %495 }
 0x7f6   :  { %v787_v15 = vpop.eup %786 }
 0x7f7   :  { %v489_v16 = vadd.f32 1.0, %v787_v15 }
 0x7f9   :  { %788 = vrcp.f32 %v489_v16 }
 0x803   :  { %v789_v17 = vpop.eup %788 }
 0x804   :  { %709 = vmatpush3.msk.msra.mxu1 %vm184_vm5, %v789_v17 }
 0x805   :  { %711 = vmatmul.mubr.msk.f32.vlgmr.msra.gmra.mrb[4].mxu1 %vm223_vm4, %v181_v47 }
 0x8d8   :  { %v567_v19 = vpop.f32.mrb[4].mxu1 }
 0x8d9   :  { %v568_v20 = vadd.f32 %v567_v19, %v496_v18  ;;  %v712_v21 = vpop.f32.mrb[5].mxu1 }
 0x8db   :  { %v572_v22 = vsel %vm571_vm8, %v568_v20, -inf }
 0x8dc   :  { %v573_v23 = vrot.slane %v572_v22, 4 }
 0x8de   :  { %v574_v24 = vmax.f32 %v572_v22, %v573_v23 }
 0x8e0   :  { %v575_v25 = vrot.slane %v574_v24, 2 }
 0x8e2   :  { %v576_v26 = vmax.f32 %v574_v24, %v575_v25 }
 0x8e4   :  { %v577_v27 = vrot.slane %v576_v26, 1 }
 0x8e6   :  { %v578_v28 = vmax.f32 %v576_v26, %v577_v27 }
 0x8e8   :  { %v579_v29 = vsub.f32 %v568_v20, %v578_v28 }
 0x8ea   :  { %v580_v30 = vmul.f32 1.442695, %v579_v29 }
 0x8ec   :  { %790 = vpow2.f32 %v580_v30 }
 0x8f6   :  { %v791_v31 = vpop.eup %790 }
 0x8f7   :  { %v582_v62 = vsel %vm571_vm8, %v791_v31, 0.0 }
 0x8f8   :  { %v583_v32 = vrot.slane %v582_v62, 4 }
 0x8fa   :  { %v584_v33 = vadd.f32 %v583_v32, %v582_v62 }
 0x8fc   :  { %v585_v34 = vrot.slane %v584_v33, 2 }
 0x8fe   :  { %v586_v35 = vadd.f32 %v585_v34, %v584_v33 }
 0x900   :  { %v587_v36 = vrot.slane %v586_v35, 1 }
 0x902   :  { %v588_v37 = vadd.f32 %v587_v36, %v586_v35 }
 0x904   :  { %792 = vlog2.f32 %v588_v37 }
 0x90e   :  { %v793_v38 = vpop.eup %792 }
 0x90f   :  { %v590_v39 = vmul.f32 0.6931472, %v793_v38 }
 0x911   :  { %v591_v40 = vsub.f32 %v579_v29, %v590_v39 }
 0x913   :  { %592 = vst [vmem:[#allocation5] sm:$0xf] %v591_v40 }
 0x914   :  { %805 = shalt.err (!%p802_p4)
}
 0x915   :  { %s806_s7 = scalar_lea.hbm %s1000_s2, 64 }
 0x916   :  { %p807_p5 = scmp.ne.s32.totalorder %s1000_s2, %s806_s7  ;;  %p810_p6 = scmp.lt.u32.totalorder %s806_s7, %s1000_s2 }
 0x918   :  { %p812_p7 = pnand %p810_p6, %p807_p5 }
 0x91a   :  { %815 = shalt.err (!%p812_p7)
}
 0x91b   :  { %602 = dma.vmem_to_hbm [thread:$0]  %s600_s3, 64, %s1000_s2, [#allocation6]  }
 0x91c   :  { %816 = dma.done.wait [#allocation6], 64  }
 0x91d   :  { %817 = vsyncadd [#allocation6], 4294967232 }
 0x91e   :  { %606 = vsyncpa [#allocation6], 1 }

</bundles_post_ra>
